<compile_context>
chip_gen: v7x
topology: tpu7x:2x2x1
jax: 0.10.0
libtpu: 0.0.40
codegen_flags: <defaults>
</compile_context>

<pallas_src>
import jax
import jax.numpy as jnp
from jax.experimental import pallas as pl
from jax.experimental.pallas import tpu as pltpu

N, C, L, K = 2, 32, 16, 3        # batch, channels (fixed by module), length, taps
NL = N * L                        # batch folded into the lane axis
EPS = 1e-5                        # BatchNorm1d default eps


def residual_block_kernel(x_ref,
                          w1_ref, g1_ref, be1_ref,
                          w2_ref, g2_ref, be2_ref,
                          w3_ref, g3_ref, be3_ref,
                          out_ref):
    """Whole residual block on a single (C, N*L) tile resident in VMEM.

    x_ref:   (C, N*L)        input, batch folded along lanes (sample n -> lanes [n*L, (n+1)*L))
    w*_ref:  (C, K*C)        tap-stacked conv weights: [W_k=0 | W_k=1 | W_k=2], each (Cout, Cin)
    g*_ref / be*_ref: (C, 1) BatchNorm gamma / beta (conv bias cancels under training-mode BN)
    out_ref: (C, N*L)        output
    """
    x = x_ref[...]                                            # (C, NL) f32

    # ---- constant shift-selection matrices, built once from iotas (VPU only) ----
    # slab_s = y @ S_s  gives  slab_s[:, g] = y[:, g + s]  with per-sample zero padding.
    row = jax.lax.broadcasted_iota(jnp.int32, (NL, NL), 0)    # source lane g'
    col = jax.lax.broadcasted_iota(jnp.int32, (NL, NL), 1)    # destination lane g
    col_t = col % L                                           # position within its sample

    def shift_mat(s):
        valid = (col_t + s >= 0) & (col_t + s < L)            # stay inside the sample
        sel = (row == col + s) & valid
        return jnp.where(sel, 1.0, 0.0).astype(jnp.float32)

    s_m1, s_p1 = shift_mat(-1), shift_mat(1)                  # layers 2/3 (dilation 1)
    s_m2, s_p2 = shift_mat(-2), shift_mat(2)                  # layer 1   (dilation 2)

    def conv_bn_relu(y, w_ref, g_ref, be_ref, s_neg, s_pos):
        # im2col slab: rows [0:C) = y shifted by -d, [C:2C) = y, [2C:3C) = y shifted by +d.
        slab = jnp.concatenate(
            [jnp.dot(y, s_neg, preferred_element_type=jnp.float32),
             y,
             jnp.dot(y, s_pos, preferred_element_type=jnp.float32)],
            axis=0)                                           # (3C, NL)
        conv = jnp.dot(w_ref[...], slab,
                       preferred_element_type=jnp.float32)    # (C, NL) fused over taps

        # Training-mode BatchNorm1d: stats over (batch, length) == all NL lanes.
        # Conv bias cancels exactly here, so it is never added.
        inv_n = 1.0 / float(NL)
        mean = conv.sum(axis=1, keepdims=True) * inv_n        # (C, 1)
        var = (conv * conv).sum(axis=1, keepdims=True) * inv_n - mean * mean
        scale = g_ref[...] * jax.lax.rsqrt(var + EPS)         # (C, 1)
        shift = be_ref[...] - mean * scale                    # (C, 1)
        return jnp.maximum(conv * scale + shift, 0.0)         # ReLU

    y = conv_bn_relu(x, w1_ref, g1_ref, be1_ref, s_m2, s_p2)  # Conv1d(k3, pad2, dil2)
    y = conv_bn_relu(y, w2_ref, g2_ref, be2_ref, s_m1, s_p1)  # Conv1d(k3, pad1)
    y = conv_bn_relu(y, w3_ref, g3_ref, be3_ref, s_m1, s_p1)  # Conv1d(k3, pad1)

    out_ref[...] = x + y                                      # residual add


@jax.jit
def residual_block_forward(x, params):
    (w1, b1, g1, be1), (w2, b2, g2, be2), (w3, b3, g3, be3) = params
    # Conv biases cancel exactly under the training-mode BatchNorm that follows
    # each conv, so they are not passed to the kernel.
    del b1, b2, b3

    def wcat(w):   # PyTorch (Cout, Cin, K) -> (Cout, K*Cin), tap-major blocks
        return jnp.transpose(w, (0, 2, 1)).reshape(C, K * C)

    def colv(v):   # (C,) -> (C, 1) column for sublane broadcast
        return v.reshape(C, 1)

    # Fold batch into the lane axis: (N, C, L) -> (C, N*L).
    x2d = jnp.transpose(x, (1, 0, 2)).reshape(C, NL)

    args = (x2d,
            wcat(w1), colv(g1), colv(be1),
            wcat(w2), colv(g2), colv(be2),
            wcat(w3), colv(g3), colv(be3))

    out2d = pl.pallas_call(
        residual_block_kernel,
        out_shape=jax.ShapeDtypeStruct((C, NL), jnp.float32),
        in_specs=[pl.BlockSpec(memory_space=pltpu.MemorySpace.VMEM)] * len(args),
        out_specs=pl.BlockSpec(memory_space=pltpu.MemorySpace.VMEM),
    )(*args)

    return jnp.transpose(out2d.reshape(C, N, L), (1, 0, 2))   # back to (N, C, L)


# ---------------- pure-JAX reference (for correctness check only) -------------
def _conv1d_ref(x, w, b, dilation, padding):
    out = jax.lax.conv_general_dilated(
        x, w, window_strides=(1,), padding=[(padding, padding)],
        rhs_dilation=(dilation,), dimension_numbers=('NCH', 'OIH', 'NCH'))
    return out + b[None, :, None]


def _bn_relu_ref(x, gamma, beta):
    mean = x.mean(axis=(0, 2), keepdims=True)
    var = x.var(axis=(0, 2), keepdims=True)          # biased, training-mode BN
    y = (x - mean) * jax.lax.rsqrt(var + EPS)
    y = y * gamma[None, :, None] + beta[None, :, None]
    return jnp.maximum(y, 0.0)


def _forward_ref(x, params):
    (w1, b1, g1, be1), (w2, b2, g2, be2), (w3, b3, g3, be3) = params
    y = _bn_relu_ref(_conv1d_ref(x, w1, b1, 2, 2), g1, be1)
    y = _bn_relu_ref(_conv1d_ref(y, w2, b2, 1, 1), g2, be2)
    y = _bn_relu_ref(_conv1d_ref(y, w3, b3, 1, 1), g3, be3)
    return x + y


def _init_params(key):
    params = []
    for _ in range(3):
        kw, kb, kg, kbe, key = jax.random.split(key, 5)
        w = jax.random.normal(kw, (C, C, K), jnp.float32) * 0.1
        b = jax.random.normal(kb, (C,), jnp.float32) * 0.1
        g = 1.0 + 0.1 * jax.random.normal(kg, (C,), jnp.float32)
        be = 0.1 * jax.random.normal(kbe, (C,), jnp.float32)
        params.append((w, b, g, be))
    return tuple(params)


if __name__ == "__main__":
    key = jax.random.PRNGKey(0)
    kx, kp = jax.random.split(key)
    x = jax.random.normal(kx, (N, C, L), jnp.float32)
    params = _init_params(kp)

    out = residual_block_forward(x, params)
    out = jax.block_until_ready(out)

    ref = _forward_ref(x, params)
    assert out.shape == (N, C, L)
    assert jnp.allclose(out, ref, atol=1e-4, rtol=1e-4), \
        f"max abs err {jnp.max(jnp.abs(out - ref))}"

    print("KERNEL_OK")
</pallas_src>

<mosaic_0001>
module attributes {stable_mosaic.version = 11 : i64} {
  func.func @residual_block_kernel(%arg0: memref<32x32xf32, #tpu.memory_space<vmem>>, %arg1: memref<32x96xf32, #tpu.memory_space<vmem>>, %arg2: memref<32x1xf32, #tpu.memory_space<vmem>>, %arg3: memref<32x1xf32, #tpu.memory_space<vmem>>, %arg4: memref<32x96xf32, #tpu.memory_space<vmem>>, %arg5: memref<32x1xf32, #tpu.memory_space<vmem>>, %arg6: memref<32x1xf32, #tpu.memory_space<vmem>>, %arg7: memref<32x96xf32, #tpu.memory_space<vmem>>, %arg8: memref<32x1xf32, #tpu.memory_space<vmem>>, %arg9: memref<32x1xf32, #tpu.memory_space<vmem>>, %arg10: memref<32x32xf32, #tpu.memory_space<vmem>>) attributes {dimension_semantics = [], scalar_prefetch = 0 : i64, scratch_operands = 0 : i64, tpu.core_type = #tpu.core_type<tc>} {
    %c0 = arith.constant 0 : index
    %c0_0 = arith.constant 0 : index
    %0 = vector.load %arg0[%c0, %c0_0] : memref<32x32xf32, #tpu.memory_space<vmem>>, vector<32x32xf32>
    %1 = tpu.iota {dimensions = array<i32: 0>} : vector<32x32xi32>
    %2 = tpu.iota {dimensions = array<i32: 1>} : vector<32x32xi32>
    %c16_i32 = arith.constant 16 : i32
    %c0_i32 = arith.constant 0 : i32
    %3 = arith.cmpi eq, %c16_i32, %c0_i32 : i32
    %c1_i32 = arith.constant 1 : i32
    %4 = arith.select %3, %c1_i32, %c16_i32 : i32
    %5 = vector.broadcast %4 : i32 to vector<32x32xi32>
    %6 = arith.remsi %2, %5 : vector<32x32xi32>
    %c0_i32_1 = arith.constant 0 : i32
    %7 = vector.broadcast %c0_i32_1 : i32 to vector<32x32xi32>
    %8 = arith.cmpi ne, %6, %7 : vector<32x32xi32>
    %c0_i32_2 = arith.constant 0 : i32
    %9 = vector.broadcast %c0_i32_2 : i32 to vector<32x32xi32>
    %10 = arith.cmpi slt, %6, %9 : vector<32x32xi32>
    %c0_i32_3 = arith.constant 0 : i32
    %11 = arith.cmpi slt, %4, %c0_i32_3 : i32
    %12 = vector.broadcast %11 : i1 to vector<32x32xi1>
    %13 = vector.broadcast %12 : vector<32x32xi1> to vector<32x32xi1>
    %14 = arith.xori %10, %13 : vector<32x32xi1>
    %15 = arith.andi %14, %8 : vector<32x32xi1>
    %16 = vector.broadcast %4 : i32 to vector<32x32xi32>
    %17 = arith.addi %6, %16 : vector<32x32xi32>
    %18 = arith.select %15, %17, %6 : vector<32x32xi1>, vector<32x32xi32>
    %c-1_i32 = arith.constant -1 : i32
    %19 = vector.broadcast %c-1_i32 : i32 to vector<32x32xi32>
    %20 = arith.addi %18, %19 : vector<32x32xi32>
    %c0_i32_4 = arith.constant 0 : i32
    %21 = vector.broadcast %c0_i32_4 : i32 to vector<32x32xi32>
    %22 = arith.cmpi sge, %20, %21 : vector<32x32xi32>
    %c-1_i32_5 = arith.constant -1 : i32
    %23 = vector.broadcast %c-1_i32_5 : i32 to vector<32x32xi32>
    %24 = arith.addi %18, %23 : vector<32x32xi32>
    %c16_i32_6 = arith.constant 16 : i32
    %25 = vector.broadcast %c16_i32_6 : i32 to vector<32x32xi32>
    %26 = arith.cmpi slt, %24, %25 : vector<32x32xi32>
    %27 = arith.andi %22, %26 : vector<32x32xi1>
    %c-1_i32_7 = arith.constant -1 : i32
    %28 = vector.broadcast %c-1_i32_7 : i32 to vector<32x32xi32>
    %29 = arith.addi %2, %28 : vector<32x32xi32>
    %30 = arith.cmpi eq, %1, %29 : vector<32x32xi32>
    %31 = arith.andi %30, %27 : vector<32x32xi1>
    %cst = arith.constant 1.000000e+00 : f32
    %cst_8 = arith.constant 0.000000e+00 : f32
    %32 = vector.broadcast %cst : f32 to vector<32x32xf32>
    %33 = vector.broadcast %cst_8 : f32 to vector<32x32xf32>
    %34 = arith.select %31, %32, %33 : vector<32x32xi1>, vector<32x32xf32>
    %c1_i32_9 = arith.constant 1 : i32
    %35 = vector.broadcast %c1_i32_9 : i32 to vector<32x32xi32>
    %36 = arith.addi %18, %35 : vector<32x32xi32>
    %c0_i32_10 = arith.constant 0 : i32
    %37 = vector.broadcast %c0_i32_10 : i32 to vector<32x32xi32>
    %38 = arith.cmpi sge, %36, %37 : vector<32x32xi32>
    %c1_i32_11 = arith.constant 1 : i32
    %39 = vector.broadcast %c1_i32_11 : i32 to vector<32x32xi32>
    %40 = arith.addi %18, %39 : vector<32x32xi32>
    %c16_i32_12 = arith.constant 16 : i32
    %41 = vector.broadcast %c16_i32_12 : i32 to vector<32x32xi32>
    %42 = arith.cmpi slt, %40, %41 : vector<32x32xi32>
    %43 = arith.andi %38, %42 : vector<32x32xi1>
    %c1_i32_13 = arith.constant 1 : i32
    %44 = vector.broadcast %c1_i32_13 : i32 to vector<32x32xi32>
    %45 = arith.addi %2, %44 : vector<32x32xi32>
    %46 = arith.cmpi eq, %1, %45 : vector<32x32xi32>
    %47 = arith.andi %46, %43 : vector<32x32xi1>
    %cst_14 = arith.constant 1.000000e+00 : f32
    %cst_15 = arith.constant 0.000000e+00 : f32
    %48 = vector.broadcast %cst_14 : f32 to vector<32x32xf32>
    %49 = vector.broadcast %cst_15 : f32 to vector<32x32xf32>
    %50 = arith.select %47, %48, %49 : vector<32x32xi1>, vector<32x32xf32>
    %c-2_i32 = arith.constant -2 : i32
    %51 = vector.broadcast %c-2_i32 : i32 to vector<32x32xi32>
    %52 = arith.addi %18, %51 : vector<32x32xi32>
    %c0_i32_16 = arith.constant 0 : i32
    %53 = vector.broadcast %c0_i32_16 : i32 to vector<32x32xi32>
    %54 = arith.cmpi sge, %52, %53 : vector<32x32xi32>
    %c-2_i32_17 = arith.constant -2 : i32
    %55 = vector.broadcast %c-2_i32_17 : i32 to vector<32x32xi32>
    %56 = arith.addi %18, %55 : vector<32x32xi32>
    %c16_i32_18 = arith.constant 16 : i32
    %57 = vector.broadcast %c16_i32_18 : i32 to vector<32x32xi32>
    %58 = arith.cmpi slt, %56, %57 : vector<32x32xi32>
    %59 = arith.andi %54, %58 : vector<32x32xi1>
    %c-2_i32_19 = arith.constant -2 : i32
    %60 = vector.broadcast %c-2_i32_19 : i32 to vector<32x32xi32>
    %61 = arith.addi %2, %60 : vector<32x32xi32>
    %62 = arith.cmpi eq, %1, %61 : vector<32x32xi32>
    %63 = arith.andi %62, %59 : vector<32x32xi1>
    %cst_20 = arith.constant 1.000000e+00 : f32
    %cst_21 = arith.constant 0.000000e+00 : f32
    %64 = vector.broadcast %cst_20 : f32 to vector<32x32xf32>
    %65 = vector.broadcast %cst_21 : f32 to vector<32x32xf32>
    %66 = arith.select %63, %64, %65 : vector<32x32xi1>, vector<32x32xf32>
    %c2_i32 = arith.constant 2 : i32
    %67 = vector.broadcast %c2_i32 : i32 to vector<32x32xi32>
    %68 = arith.addi %18, %67 : vector<32x32xi32>
    %c0_i32_22 = arith.constant 0 : i32
    %69 = vector.broadcast %c0_i32_22 : i32 to vector<32x32xi32>
    %70 = arith.cmpi sge, %68, %69 : vector<32x32xi32>
    %c2_i32_23 = arith.constant 2 : i32
    %71 = vector.broadcast %c2_i32_23 : i32 to vector<32x32xi32>
    %72 = arith.addi %18, %71 : vector<32x32xi32>
    %c16_i32_24 = arith.constant 16 : i32
    %73 = vector.broadcast %c16_i32_24 : i32 to vector<32x32xi32>
    %74 = arith.cmpi slt, %72, %73 : vector<32x32xi32>
    %75 = arith.andi %70, %74 : vector<32x32xi1>
    %c2_i32_25 = arith.constant 2 : i32
    %76 = vector.broadcast %c2_i32_25 : i32 to vector<32x32xi32>
    %77 = arith.addi %2, %76 : vector<32x32xi32>
    %78 = arith.cmpi eq, %1, %77 : vector<32x32xi32>
    %79 = arith.andi %78, %75 : vector<32x32xi1>
    %cst_26 = arith.constant 1.000000e+00 : f32
    %cst_27 = arith.constant 0.000000e+00 : f32
    %80 = vector.broadcast %cst_26 : f32 to vector<32x32xf32>
    %81 = vector.broadcast %cst_27 : f32 to vector<32x32xf32>
    %82 = arith.select %79, %80, %81 : vector<32x32xi1>, vector<32x32xf32>
    %cst_28 = arith.constant dense<0.000000e+00> : vector<32x32xf32>
    %83 = tpu.matmul %0, %66, %cst_28 {dimension_numbers = #tpu.dot_dimension_numbers<[1], [0], [0], [1], [0, 0, 1, 1], [], []>} : vector<32x32xf32>, vector<32x32xf32>, vector<32x32xf32> -> vector<32x32xf32>
    %cst_29 = arith.constant dense<0.000000e+00> : vector<32x32xf32>
    %84 = tpu.matmul %0, %82, %cst_29 {dimension_numbers = #tpu.dot_dimension_numbers<[1], [0], [0], [1], [0, 0, 1, 1], [], []>} : vector<32x32xf32>, vector<32x32xf32>, vector<32x32xf32> -> vector<32x32xf32>
    %85 = tpu.concatenate %83, %0, %84 in 0 : vector<32x32xf32>, vector<32x32xf32>, vector<32x32xf32> -> vector<96x32xf32>
    %c0_30 = arith.constant 0 : index
    %c0_31 = arith.constant 0 : index
    %86 = vector.load %arg1[%c0_30, %c0_31] : memref<32x96xf32, #tpu.memory_space<vmem>>, vector<32x96xf32>
    %cst_32 = arith.constant dense<0.000000e+00> : vector<32x32xf32>
    %87 = tpu.matmul %86, %85, %cst_32 {dimension_numbers = #tpu.dot_dimension_numbers<[1], [0], [0], [1], [0, 0, 1, 1], [], []>} : vector<32x96xf32>, vector<96x32xf32>, vector<32x32xf32> -> vector<32x32xf32>
    %cst_33 = arith.constant dense<0.000000e+00> : vector<32xf32>
    %88 = vector.multi_reduction <add>, %87, %cst_33 [1] : vector<32x32xf32> to vector<32xf32>
    %89 = vector.shape_cast %88 : vector<32xf32> to vector<32x1xf32>
    %cst_34 = arith.constant 3.125000e-02 : f32
    %90 = vector.broadcast %cst_34 : f32 to vector<32x1xf32>
    %91 = arith.mulf %89, %90 : vector<32x1xf32>
    %92 = arith.mulf %87, %87 : vector<32x32xf32>
    %cst_35 = arith.constant dense<0.000000e+00> : vector<32xf32>
    %93 = vector.multi_reduction <add>, %92, %cst_35 [1] : vector<32x32xf32> to vector<32xf32>
    %94 = vector.shape_cast %93 : vector<32xf32> to vector<32x1xf32>
    %cst_36 = arith.constant 3.125000e-02 : f32
    %95 = vector.broadcast %cst_36 : f32 to vector<32x1xf32>
    %96 = arith.mulf %94, %95 : vector<32x1xf32>
    %97 = arith.mulf %91, %91 : vector<32x1xf32>
    %98 = arith.subf %96, %97 : vector<32x1xf32>
    %c0_37 = arith.constant 0 : index
    %c0_38 = arith.constant 0 : index
    %99 = vector.load %arg2[%c0_37, %c0_38] : memref<32x1xf32, #tpu.memory_space<vmem>>, vector<32x1xf32>
    %cst_39 = arith.constant 9.99999974E-6 : f32
    %100 = vector.broadcast %cst_39 : f32 to vector<32x1xf32>
    %101 = arith.addf %98, %100 : vector<32x1xf32>
    %102 = math.rsqrt %101 : vector<32x1xf32>
    %103 = arith.mulf %99, %102 : vector<32x1xf32>
    %c0_40 = arith.constant 0 : index
    %c0_41 = arith.constant 0 : index
    %104 = vector.load %arg3[%c0_40, %c0_41] : memref<32x1xf32, #tpu.memory_space<vmem>>, vector<32x1xf32>
    %105 = arith.mulf %91, %103 : vector<32x1xf32>
    %106 = arith.subf %104, %105 : vector<32x1xf32>
    %107 = vector.broadcast %103 : vector<32x1xf32> to vector<32x32xf32>
    %108 = arith.mulf %87, %107 : vector<32x32xf32>
    %109 = vector.broadcast %106 : vector<32x1xf32> to vector<32x32xf32>
    %110 = arith.addf %108, %109 : vector<32x32xf32>
    %cst_42 = arith.constant 0.000000e+00 : f32
    %111 = vector.broadcast %cst_42 : f32 to vector<32x32xf32>
    %112 = arith.maximumf %110, %111 : vector<32x32xf32>
    %cst_43 = arith.constant dense<0.000000e+00> : vector<32x32xf32>
    %113 = tpu.matmul %112, %34, %cst_43 {dimension_numbers = #tpu.dot_dimension_numbers<[1], [0], [0], [1], [0, 0, 1, 1], [], []>} : vector<32x32xf32>, vector<32x32xf32>, vector<32x32xf32> -> vector<32x32xf32>
    %cst_44 = arith.constant dense<0.000000e+00> : vector<32x32xf32>
    %114 = tpu.matmul %112, %50, %cst_44 {dimension_numbers = #tpu.dot_dimension_numbers<[1], [0], [0], [1], [0, 0, 1, 1], [], []>} : vector<32x32xf32>, vector<32x32xf32>, vector<32x32xf32> -> vector<32x32xf32>
    %115 = tpu.concatenate %113, %112, %114 in 0 : vector<32x32xf32>, vector<32x32xf32>, vector<32x32xf32> -> vector<96x32xf32>
    %c0_45 = arith.constant 0 : index
    %c0_46 = arith.constant 0 : index
    %116 = vector.load %arg4[%c0_45, %c0_46] : memref<32x96xf32, #tpu.memory_space<vmem>>, vector<32x96xf32>
    %cst_47 = arith.constant dense<0.000000e+00> : vector<32x32xf32>
    %117 = tpu.matmul %116, %115, %cst_47 {dimension_numbers = #tpu.dot_dimension_numbers<[1], [0], [0], [1], [0, 0, 1, 1], [], []>} : vector<32x96xf32>, vector<96x32xf32>, vector<32x32xf32> -> vector<32x32xf32>
    %cst_48 = arith.constant dense<0.000000e+00> : vector<32xf32>
    %118 = vector.multi_reduction <add>, %117, %cst_48 [1] : vector<32x32xf32> to vector<32xf32>
    %119 = vector.shape_cast %118 : vector<32xf32> to vector<32x1xf32>
    %cst_49 = arith.constant 3.125000e-02 : f32
    %120 = vector.broadcast %cst_49 : f32 to vector<32x1xf32>
    %121 = arith.mulf %119, %120 : vector<32x1xf32>
    %122 = arith.mulf %117, %117 : vector<32x32xf32>
    %cst_50 = arith.constant dense<0.000000e+00> : vector<32xf32>
    %123 = vector.multi_reduction <add>, %122, %cst_50 [1] : vector<32x32xf32> to vector<32xf32>
    %124 = vector.shape_cast %123 : vector<32xf32> to vector<32x1xf32>
    %cst_51 = arith.constant 3.125000e-02 : f32
    %125 = vector.broadcast %cst_51 : f32 to vector<32x1xf32>
    %126 = arith.mulf %124, %125 : vector<32x1xf32>
    %127 = arith.mulf %121, %121 : vector<32x1xf32>
    %128 = arith.subf %126, %127 : vector<32x1xf32>
    %c0_52 = arith.constant 0 : index
    %c0_53 = arith.constant 0 : index
    %129 = vector.load %arg5[%c0_52, %c0_53] : memref<32x1xf32, #tpu.memory_space<vmem>>, vector<32x1xf32>
    %cst_54 = arith.constant 9.99999974E-6 : f32
    %130 = vector.broadcast %cst_54 : f32 to vector<32x1xf32>
    %131 = arith.addf %128, %130 : vector<32x1xf32>
    %132 = math.rsqrt %131 : vector<32x1xf32>
    %133 = arith.mulf %129, %132 : vector<32x1xf32>
    %c0_55 = arith.constant 0 : index
    %c0_56 = arith.constant 0 : index
    %134 = vector.load %arg6[%c0_55, %c0_56] : memref<32x1xf32, #tpu.memory_space<vmem>>, vector<32x1xf32>
    %135 = arith.mulf %121, %133 : vector<32x1xf32>
    %136 = arith.subf %134, %135 : vector<32x1xf32>
    %137 = vector.broadcast %133 : vector<32x1xf32> to vector<32x32xf32>
    %138 = arith.mulf %117, %137 : vector<32x32xf32>
    %139 = vector.broadcast %136 : vector<32x1xf32> to vector<32x32xf32>
    %140 = arith.addf %138, %139 : vector<32x32xf32>
    %cst_57 = arith.constant 0.000000e+00 : f32
    %141 = vector.broadcast %cst_57 : f32 to vector<32x32xf32>
    %142 = arith.maximumf %140, %141 : vector<32x32xf32>
    %cst_58 = arith.constant dense<0.000000e+00> : vector<32x32xf32>
    %143 = tpu.matmul %142, %34, %cst_58 {dimension_numbers = #tpu.dot_dimension_numbers<[1], [0], [0], [1], [0, 0, 1, 1], [], []>} : vector<32x32xf32>, vector<32x32xf32>, vector<32x32xf32> -> vector<32x32xf32>
    %cst_59 = arith.constant dense<0.000000e+00> : vector<32x32xf32>
    %144 = tpu.matmul %142, %50, %cst_59 {dimension_numbers = #tpu.dot_dimension_numbers<[1], [0], [0], [1], [0, 0, 1, 1], [], []>} : vector<32x32xf32>, vector<32x32xf32>, vector<32x32xf32> -> vector<32x32xf32>
    %145 = tpu.concatenate %143, %142, %144 in 0 : vector<32x32xf32>, vector<32x32xf32>, vector<32x32xf32> -> vector<96x32xf32>
    %c0_60 = arith.constant 0 : index
    %c0_61 = arith.constant 0 : index
    %146 = vector.load %arg7[%c0_60, %c0_61] : memref<32x96xf32, #tpu.memory_space<vmem>>, vector<32x96xf32>
    %cst_62 = arith.constant dense<0.000000e+00> : vector<32x32xf32>
    %147 = tpu.matmul %146, %145, %cst_62 {dimension_numbers = #tpu.dot_dimension_numbers<[1], [0], [0], [1], [0, 0, 1, 1], [], []>} : vector<32x96xf32>, vector<96x32xf32>, vector<32x32xf32> -> vector<32x32xf32>
    %cst_63 = arith.constant dense<0.000000e+00> : vector<32xf32>
    %148 = vector.multi_reduction <add>, %147, %cst_63 [1] : vector<32x32xf32> to vector<32xf32>
    %149 = vector.shape_cast %148 : vector<32xf32> to vector<32x1xf32>
    %cst_64 = arith.constant 3.125000e-02 : f32
    %150 = vector.broadcast %cst_64 : f32 to vector<32x1xf32>
    %151 = arith.mulf %149, %150 : vector<32x1xf32>
    %152 = arith.mulf %147, %147 : vector<32x32xf32>
    %cst_65 = arith.constant dense<0.000000e+00> : vector<32xf32>
    %153 = vector.multi_reduction <add>, %152, %cst_65 [1] : vector<32x32xf32> to vector<32xf32>
    %154 = vector.shape_cast %153 : vector<32xf32> to vector<32x1xf32>
    %cst_66 = arith.constant 3.125000e-02 : f32
    %155 = vector.broadcast %cst_66 : f32 to vector<32x1xf32>
    %156 = arith.mulf %154, %155 : vector<32x1xf32>
    %157 = arith.mulf %151, %151 : vector<32x1xf32>
    %158 = arith.subf %156, %157 : vector<32x1xf32>
    %c0_67 = arith.constant 0 : index
    %c0_68 = arith.constant 0 : index
    %159 = vector.load %arg8[%c0_67, %c0_68] : memref<32x1xf32, #tpu.memory_space<vmem>>, vector<32x1xf32>
    %cst_69 = arith.constant 9.99999974E-6 : f32
    %160 = vector.broadcast %cst_69 : f32 to vector<32x1xf32>
    %161 = arith.addf %158, %160 : vector<32x1xf32>
    %162 = math.rsqrt %161 : vector<32x1xf32>
    %163 = arith.mulf %159, %162 : vector<32x1xf32>
    %c0_70 = arith.constant 0 : index
    %c0_71 = arith.constant 0 : index
    %164 = vector.load %arg9[%c0_70, %c0_71] : memref<32x1xf32, #tpu.memory_space<vmem>>, vector<32x1xf32>
    %165 = arith.mulf %151, %163 : vector<32x1xf32>
    %166 = arith.subf %164, %165 : vector<32x1xf32>
    %167 = vector.broadcast %163 : vector<32x1xf32> to vector<32x32xf32>
    %168 = arith.mulf %147, %167 : vector<32x32xf32>
    %169 = vector.broadcast %166 : vector<32x1xf32> to vector<32x32xf32>
    %170 = arith.addf %168, %169 : vector<32x32xf32>
    %cst_72 = arith.constant 0.000000e+00 : f32
    %171 = vector.broadcast %cst_72 : f32 to vector<32x32xf32>
    %172 = arith.maximumf %170, %171 : vector<32x32xf32>
    %173 = arith.addf %0, %172 : vector<32x32xf32>
    %c0_73 = arith.constant 0 : index
    %c0_74 = arith.constant 0 : index
    %174 = vector.load %arg10[%c0_73, %c0_74] : memref<32x32xf32, #tpu.memory_space<vmem>>, vector<32x32xf32>
    tpu.vector_store %arg10[%c0_73, %c0_74], %173 {strides = array<i32>} : memref<32x32xf32, #tpu.memory_space<vmem>>, vector<32x32xf32>,
    return
  }
}

</mosaic_0001>

<bundles_post_ra>
// kernel: residual_block_forward.1
= control target key start
LH: loop header
LB: loop body
LE: loop exit
PB: predicated region body
PF: predicated region fallthrough
CT: control target
= control target key end

     0   :  { %v39_v0 = vlaneseq  ;;  %vm126_vm0 = vcmask 261120   ;;  %v1843_v12 = vmov 1.0|1.0   ;;  %v1844_v51 = vmov 0   ;;  %s2292_s0 = inlined_call_operand.vmem [shape: f32[32,32], index: 0, kind: input, shape index: {}]   ;;  %s2293_s1 = inlined_call_operand.vmem [shape: f32[32,96], index: 1, kind: input, shape index: {}]   ;;  %s2294_s2 = inlined_call_operand.vmem [shape: f32[32,1], index: 2, kind: input, shape index: {}]   ;;  %s2295_s3 = inlined_call_operand.vmem [shape: f32[32,1], index: 3, kind: input, shape index: {}]   ;;  %s2296_s4 = inlined_call_operand.vmem [shape: f32[32,96], index: 4, kind: input, shape index: {}]   ;;  %s2297_s5 = inlined_call_operand.vmem [shape: f32[32,1], index: 5, kind: input, shape index: {}]   ;;  %s2298_s6 = inlined_call_operand.vmem [shape: f32[32,1], index: 6, kind: input, shape index: {}]   ;;  %s2299_s7 = inlined_call_operand.vmem [shape: f32[32,96], index: 7, kind: input, shape index: {}]   ;;  %s2300_s8 = inlined_call_operand.vmem [shape: f32[32,1], index: 8, kind: input, shape index: {}]   ;;  %s2301_s9 = inlined_call_operand.vmem [shape: f32[32,1], index: 9, kind: input, shape index: {}]   ;;  %s2302_s10 = inlined_call_operand.vmem [shape: f32[32,32], index: 10, kind: output, shape index: {}]  }
   0x1   :  { %v1903_v1 = vld [vmem:[%s2292_s0] sm:$0xff]  ;;  %v36_v14 = vld [vmem:[%s2292_s0 + $0x8] sm:$0xff]  ;;  %v37_v15 = vld [vmem:[%s2292_s0 + $0x10] sm:$0xff]  ;;  %1814 = vset.pattern.permute.xlu1 %v1844_v51  ;;  %1813 = vset.pattern.permute.xlu0 %v1844_v51 }
   0x2   :  { %v1905_v2 = vshrl.u32 %v39_v0, 7  ;;  %v1907_v3 = vand.u32 127, %v39_v0  ;;  %1525 = vmatprep.mubr.msk.f32.mxu1 %vm126_vm0, %v1903_v1  ;;  %v38_v16 = vld [vmem:[%s2292_s0 + $0x18] sm:$0xff]  ;;  %v309_v17 = vld [vmem:[%s2293_s1] sm:$0xff]  ;;  %v1715_v24 = vpack.c.bf16 %v36_v14, %v1903_v1  ;;  %v310_v32 = vld [vmem:[%s2293_s1 + $0x8] sm:$0xff] }
   0x3   :  { %v1719_v28 = vpack.c.bf16 %v38_v16, %v37_v15  ;;  %v311_v33 = vld [vmem:[%s2293_s1 + $0x10] sm:$0xff]  ;;  %v312_v34 = vld [vmem:[%s2293_s1 + $0x18] sm:$0xff] }
   0x4   :  { %v1912_v4 = vadd.s32 8, %v1905_v2  ;;  %v1915_v5 = vand.u32 15, %v1907_v3  ;;  %v96_v6 = vadd.s32 4294967294, %v1907_v3  ;;  %v1919_v7 = vadd.s32 16, %v1905_v2  ;;  %v474_v51 = vld [vmem:[%s2295_s3 + $0x18] sm:$0xff] }
   0x5   :  { %v1924_v9 = vadd.s32 24, %v1905_v2  ;;  %v113_v11 = vadd.s32 2, %v1907_v3 }
   0x6   :  { %v92_v8 = vadd.s32 4294967294, %v1915_v5  ;;  %vm97_vm1 = vcmp.eq.s32.totalorder %v1905_v2, %v96_v6  ;;  %vm98_vm2 = vcmp.eq.s32.totalorder %v1912_v4, %v96_v6  ;;  %v109_v10 = vadd.s32 2, %v1915_v5 }
   0x7   :  { %vm99_vm5 = vcmp.eq.s32.totalorder %v1919_v7, %v96_v6  ;;  %vm100_vm7 = vcmp.eq.s32.totalorder %v1924_v9, %v96_v6  ;;  %vm114_vm11 = vcmp.eq.s32.totalorder %v1905_v2, %v113_v11  ;;  %vm115_vm13 = vcmp.eq.s32.totalorder %v1912_v4, %v113_v11 }
   0x8   :  { %vm93_vm3 = vcmp.ge.s32.totalorder %v92_v8, 0  ;;  %vm111_vm10 = vcmp.lt.s32.totalorder %v109_v10, 16 }
   0x9   :  { %vm101_vm4 = vmand %vm97_vm1, %vm93_vm3  ;;  %vm116_vm1 = vcmp.eq.s32.totalorder %v1919_v7, %v113_v11 }
   0xa   :  { %vm102_vm6 = vmand %vm98_vm2, %vm93_vm3 }
   0xb   :  { %vm1691_vm8 = vmpackc.low %vm102_vm6, %vm101_vm4  ;;  %vm117_vm4 = vcmp.eq.s32.totalorder %v1924_v9, %v113_v11 }
   0xc   :  { %1692 = vmatprep.subr.msk.bf16.mxu1 %vm1691_vm8, %v1843_v12  ;;  %vm103_vm9 = vmand %vm99_vm5, %vm93_vm3 }
   0xd   :  { %1694 = vmatpush3.bf16.msk.msra.mxu1 %vm1691_vm8, %v1843_v12  ;;  %vm104_vm12 = vmand %vm100_vm7, %vm93_vm3  ;;  %vm313_vm8 = vcmask 785408  }
   0xe   :  { %vm1695_vm14 = vmpackc.low %vm104_vm12, %vm103_vm9  ;;  %1569 = vmatprep.mubr.msk.f32.mxu0 %vm313_vm8, %v309_v17 }
   0xf   :  { %1696 = vmatprep.subr.msk.bf16.mxu1 %vm1695_vm14, %v1843_v12  ;;  %vm1937_vm15 = vmand %vm114_vm11, %vm111_vm10 }
  0x10   :  { %vm119_vm2 = vmand %vm115_vm13, %vm111_vm10 }
  0x11   :  { %1698 = vmatpush3.bf16.msk.msra.mxu1 %vm1695_vm14, %v1843_v12  ;;  %vm1699_vm3 = vmpackc.low %vm119_vm2, %vm1937_vm15 }
  0x12   :  { %1700 = vmatprep.subr.msk.bf16.mxu1 %vm1699_vm3, %v1843_v12  ;;  %vm120_vm5 = vmand %vm116_vm1, %vm111_vm10 }
  0x13   :  { %vm121_vm6 = vmand %vm117_vm4, %vm111_vm10 }
  0x14   :  { %1526 = vmatmul.mubr.msk.f32.vlgmr.msra.gmra.mrb[0].mxu1 %vm126_vm0, %v36_v14  ;;  %vm1703_vm7 = vmpackc.low %vm121_vm6, %vm120_vm5 }
  0x15   :  { %1528 = vmatprep.mubr.msk.f32.mxu1 %vm126_vm0, %v37_v15  ;;  %1702 = vmatpush3.bf16.msk.msra.mxu1 %vm1699_vm3, %v1843_v12 }
  0x16   :  { %1704 = vmatprep.subr.msk.bf16.mxu1 %vm1703_vm7, %v1843_v12 }
  0x18   :  { %1529 = vmatmul.mubr.msk.f32.gmra.mrb[2].mxu1 %vm126_vm0, %v38_v16 }
  0x19   :  { %1706 = vmatpush3.bf16.msk.msra.mxu1 %vm1703_vm7, %v1843_v12  ;;  %1539 = vmatprep.mubr.msk.f32.mxu1 %vm126_vm0, %v1903_v1 }
  0x1c   :  { %1540 = vmatmul.mubr.msk.f32.vlgmr.msra.gmra.mrb[4].mxu1 %vm126_vm0, %v36_v14 }
  0x1d   :  { %1542 = vmatprep.mubr.msk.f32.mxu1 %vm126_vm0, %v37_v15 }
  0x20   :  { %1543 = vmatmul.mubr.msk.f32.gmra.mrb[6].mxu1 %vm126_vm0, %v38_v16 }
  0xe7   :  { %v1527_v18 = vpop.f32.mrb[0].mxu1 }
  0xe8   :  { %v205_v19 = vpop.f32.mrb[1].mxu1 }
  0xe9   :  { %v1707_v20 = vpack.c.bf16 %v1527_v18, %v205_v19 }
  0xeb   :  { %v1530_v21 = vpop.f32.mrb[2].mxu1  ;;  %1708 = vmatprep.subr.bf16.mxu0 %v1707_v20 }
  0xec   :  { %v215_v22 = vpop.f32.mrb[3].mxu1  ;;  %1710 = vmatpush3.bf16.msra.mxu0 %v1707_v20 }
  0xed   :  { %v1711_v23 = vpack.c.bf16 %v1530_v21, %v215_v22  ;;  %v456_v21 = vld [vmem:[%s2294_s2 + $0x8] sm:$0xff] }
  0xef   :  { %1712 = vmatprep.subr.bf16.mxu0 %v1711_v23  ;;  %v1541_v25 = vpop.f32.mrb[4].mxu1 }
  0xf0   :  { %1714 = vmatpush3.bf16.msra.mxu0 %v1711_v23  ;;  %v290_v26 = vpop.f32.mrb[5].mxu1 }
  0xf1   :  { %1716 = vmatprep.subr.bf16.mxu0 %v1715_v24  ;;  %v1723_v27 = vpack.c.bf16 %v1541_v25, %v290_v26  ;;  %v472_v26 = vld [vmem:[%s2295_s3 + $0x8] sm:$0xff] }
  0xf3   :  { %v1544_v29 = vpop.f32.mrb[6].mxu1 }
  0xf4   :  { %1718 = vmatpush3.bf16.msra.mxu0 %v1715_v24  ;;  %v300_v30 = vpop.f32.mrb[7].mxu1 }
  0xf5   :  { %1720 = vmatprep.subr.bf16.mxu0 %v1719_v28  ;;  %v1727_v31 = vpack.c.bf16 %v1544_v29, %v300_v30 }
  0xf8   :  { %1722 = vmatpush3.bf16.msra.mxu0 %v1719_v28 }
  0xf9   :  { %1724 = vmatprep.subr.bf16.mxu0 %v1723_v27 }
  0xfc   :  { %1726 = vmatpush3.bf16.msra.mxu0 %v1723_v27  ;;  %v455_v27 = vld [vmem:[%s2294_s2] sm:$0xff] }
  0xfd   :  { %1728 = vmatprep.subr.bf16.mxu0 %v1727_v31 }
 0x100   :  { %1730 = vmatpush3.bf16.msra.mxu0 %v1727_v31 }
 0x103   :  { %1570 = vmatmul.mubr.msk.f32.vlgmr.msra.gmra.mrb[0].mxu0 %vm313_vm8, %v310_v32  ;;  %v458_v32 = vld [vmem:[%s2294_s2 + $0x18] sm:$0xff] }
 0x104   :  { %1572 = vmatprep.mubr.msk.f32.mxu0 %vm313_vm8, %v311_v33  ;;  %v58_v33 = vadd.s32 4294967295, %v1915_v5 }
 0x106   :  { %vm59_vm9 = vcmp.ge.s32.totalorder %v58_v33, 0 }
 0x107   :  { %1573 = vmatmul.mubr.msk.f32.gmra.mrb[2].mxu0 %vm313_vm8, %v312_v34  ;;  %v62_v34 = vadd.s32 4294967295, %v1907_v3 }
 0x109   :  { %vm63_vm10 = vcmp.eq.s32.totalorder %v1905_v2, %v62_v34  ;;  %vm64_vm11 = vcmp.eq.s32.totalorder %v1912_v4, %v62_v34  ;;  %vm65_vm15 = vcmp.eq.s32.totalorder %v1919_v7, %v62_v34  ;;  %vm66_vm1 = vcmp.eq.s32.totalorder %v1924_v9, %v62_v34 }
 0x10a   :  { %vm67_vm12 = vmand %vm63_vm10, %vm59_vm9 }
 0x10b   :  { %vm68_vm13 = vmand %vm64_vm11, %vm59_vm9 }
 0x10c   :  { %vm1731_vm14 = vmpackc.low %vm68_vm13, %vm67_vm12 }
 0x10d   :  { %1732 = vmatprep.subr.msk.bf16.mxu1 %vm1731_vm14, %v1843_v12  ;;  %1772 = vmatprep.subr.msk.bf16.mxu0 %vm1731_vm14, %v1843_v12  ;;  %vm69_vm2 = vmand %vm65_vm15, %vm59_vm9 }
 0x10e   :  { %1734 = vmatpush3.bf16.msk.msra.mxu1 %vm1731_vm14, %v1843_v12  ;;  %1774 = vmatpush3.bf16.msk.msra.mxu0 %vm1731_vm14, %v1843_v12  ;;  %vm70_vm4 = vmand %vm66_vm1, %vm59_vm9 }
 0x10f   :  { %vm1735_vm3 = vmpackc.low %vm70_vm4, %vm69_vm2 }
 0x110   :  { %1736 = vmatprep.subr.msk.bf16.mxu1 %vm1735_vm3, %v1843_v12  ;;  %1776 = vmatprep.subr.msk.bf16.mxu0 %vm1735_vm3, %v1843_v12 }
 0x112   :  { %1738 = vmatpush3.bf16.msk.msra.mxu1 %vm1735_vm3, %v1843_v12  ;;  %1778 = vmatpush3.bf16.msk.msra.mxu0 %vm1735_vm3, %v1843_v12 }
 0x1d6   :  { %v1987_v35 = vpop.f32.mrb[0].mxu0 }
 0x1d7   :  { %v1989_v36 = vpop.f32.mrb[1].mxu0  ;;  %v414_v37 = vsel %vm126_vm0, %v1987_v35, 0.0  ;;  %v428_v38 = vmul.f32 %v1987_v35, %v1987_v35 }
 0x1d8   :  { %415 = vadd.xlane.f32.xlu0 %v414_v37  ;;  %v427_v40 = vmul.f32 %v1989_v36, %v1989_v36  ;;  %v411_v42 = vsel %vm126_vm0, %v1989_v36, 0.0 }
 0x1d9   :  { %v434_v39 = vsel %vm126_vm0, %v428_v38, 0.0 }
 0x1da   :  { %435 = vadd.xlane.f32.xlu1 %v434_v39  ;;  %v1998_v41 = vpop.f32.mrb[2].mxu0  ;;  %v431_v44 = vsel %vm126_vm0, %v427_v40, 0.0  ;;  %v471_v40 = vld [vmem:[%s2295_s3] sm:$0xff] }
 0x1db   :  { %v2002_v43 = vpop.f32.mrb[3].mxu0  ;;  %v420_v47 = vsel %vm126_vm0, %v1998_v41, 0.0  ;;  %v430_v49 = vmul.f32 %v1998_v41, %v1998_v41 }
 0x1dc   :  { %412 = vadd.xlane.f32.xlu0 %v411_v42  ;;  %v417_v45 = vsel %vm126_vm0, %v2002_v43, 0.0  ;;  %v429_v46 = vmul.f32 %v2002_v43, %v2002_v43 }
 0x1dd   :  { %v440_v50 = vsel %vm126_vm0, %v430_v49, 0.0 }
 0x1de   :  { %432 = vadd.xlane.f32.xlu1 %v431_v44  ;;  %v437_v48 = vsel %vm126_vm0, %v429_v46, 0.0  ;;  %v457_v44 = vld [vmem:[%s2294_s2 + $0x10] sm:$0xff] }
 0x1e0   :  { %418 = vadd.xlane.f32.xlu0 %v417_v45 }
 0x1e2   :  { %421 = vadd.xlane.f32.xlu1 %v420_v47 }
 0x1e4   :  { %438 = vadd.xlane.f32.xlu0 %v437_v48  ;;  %v473_v48 = vld [vmem:[%s2295_s3 + $0x10] sm:$0xff] }
 0x1e6   :  { %441 = vadd.xlane.f32.xlu1 %v440_v50 }
 0x265   :  { %v416_v52 = vpop.xlane.xlu0 %415 }
 0x266   :  { %v424_v53 = vmul.f32 0.03125, %v416_v52  ;;  %v75_v52 = vadd.s32 1, %v1915_v5 }
 0x267   :  { %v436_v54 = vpop.xlane.xlu1 %435 }
 0x268   :  { %v448_v55 = vmul.f32 %v424_v53, %v424_v53  ;;  %v444_v56 = vmul.f32 0.03125, %v436_v54  ;;  %vm77_vm5 = vcmp.lt.s32.totalorder %v75_v52, 16 }
 0x269   :  { %v413_v57 = vpop.xlane.xlu0 %412 }
 0x26a   :  { %v452_v58 = vsub.f32 %v444_v56, %v448_v55  ;;  %v423_v59 = vmul.f32 0.03125, %v413_v57  ;;  %v1124_v55 = vld [vmem:[%s2299_s7] sm:$0xff] }
 0x26b   :  { %v433_v60 = vpop.xlane.xlu1 %432 }
 0x26c   :  { %v460_v61 = vadd.f32 1e-05, %v452_v58  ;;  %v447_v62 = vmul.f32 %v423_v59, %v423_v59  ;;  %v443_v63 = vmul.f32 0.03125, %v433_v60 }
 0x26d   :  { %v419_v0 = vpop.xlane.xlu0 %418 }
 0x26e   :  { %1815 = vrsqrt.f32 %v460_v61  ;;  %v451_v1 = vsub.f32 %v443_v63, %v447_v62  ;;  %v425_v6 = vmul.f32 0.03125, %v419_v0 }
 0x26f   :  { %v422_v8 = vpop.xlane.xlu1 %421 }
 0x270   :  { %v459_v10 = vadd.f32 1e-05, %v451_v1  ;;  %v449_v11 = vmul.f32 %v425_v6, %v425_v6  ;;  %v2015_v13 = vmul.f32 0.03125, %v422_v8 }
 0x271   :  { %v439_v14 = vpop.xlane.xlu0 %438 }
 0x272   :  { %1817 = vrsqrt.f32 %v459_v10  ;;  %v445_v15 = vmul.f32 0.03125, %v439_v14  ;;  %v450_v17 = vmul.f32 %v2015_v13, %v2015_v13 }
 0x273   :  { %v442_v16 = vpop.xlane.xlu1 %441 }
 0x274   :  { %v453_v18 = vsub.f32 %v445_v15, %v449_v11  ;;  %v446_v19 = vmul.f32 0.03125, %v442_v16 }
 0x276   :  { %v454_v20 = vsub.f32 %v446_v19, %v450_v17  ;;  %v461_v23 = vadd.f32 1e-05, %v453_v18 }
 0x278   :  { %v1816_v22 = vpop.eup %1815  ;;  %v462_v24 = vadd.f32 1e-05, %v454_v20 }
 0x279   :  { %v468_v25 = vmul.f32 %v1816_v22, %v456_v21 }
 0x27a   :  { %1819 = vrsqrt.f32 %v462_v24 }
 0x27b   :  { %490 = vperm.xlu1 %1814, %v468_v25   ;;  %v476_v28 = vmul.f32 %v468_v25, %v424_v53  ;;  %1821 = vrsqrt.f32 %v461_v23  ;;  %v79_v53 = vadd.s32 1, %v1907_v3  ;;  %v718_v25 = vld [vmem:[%s2296_s4 + $0x8] sm:$0xff] }
 0x27c   :  { %v1818_v29 = vpop.eup %1817 }
 0x27d   :  { %v480_v30 = vsub.f32 %v472_v26, %v476_v28  ;;  %v467_v31 = vmul.f32 %v1818_v29, %v455_v27  ;;  %vm80_vm6 = vcmp.eq.s32.totalorder %v1905_v2, %v79_v53  ;;  %vm81_vm7 = vcmp.eq.s32.totalorder %v1912_v4, %v79_v53  ;;  %v719_v26 = vld [vmem:[%s2296_s4 + $0x10] sm:$0xff]  ;;  %v720_v27 = vld [vmem:[%s2296_s4 + $0x18] sm:$0xff] }
 0x27e   :  { %vm84_vm9 = vmand %vm80_vm6, %vm77_vm5  ;;  %vm82_vm12 = vcmp.eq.s32.totalorder %v1919_v7, %v79_v53  ;;  %vm83_vm13 = vcmp.eq.s32.totalorder %v1924_v9, %v79_v53 }
 0x27f   :  { %514 = vperm.xlu1 %1814, %v480_v30   ;;  %485 = vperm.xlu0 %1813, %v467_v31   ;;  %v475_v38 = vmul.f32 %v467_v31, %v423_v59  ;;  %vm85_vm10 = vmand %vm81_vm7, %vm77_vm5 }
 0x280   :  { %vm2066_vm11 = vmpackc.low %vm85_vm10, %vm84_vm9 }
 0x281   :  { %v479_v45 = vsub.f32 %v471_v40, %v475_v38  ;;  %1740 = vmatprep.subr.msk.bf16.mxu1 %vm2066_vm11, %v1843_v12  ;;  %1780 = vmatprep.subr.msk.bf16.mxu0 %vm2066_vm11, %v1843_v12  ;;  %vm86_vm14 = vmand %vm82_vm12, %vm77_vm5 }
 0x282   :  { %vm87_vm15 = vmand %vm83_vm13, %vm77_vm5 }
 0x283   :  { %vm2078_vm1 = vmpackc.low %vm87_vm15, %vm86_vm14 }
 0x284   :  { %v1820_v37 = vpop.eup %1819 }
 0x285   :  { %v470_v39 = vmul.f32 %v1820_v37, %v458_v32  ;;  %v1822_v42 = vpop.eup %1821 }
 0x286   :  { %v469_v46 = vmul.f32 %v1822_v42, %v457_v44 }
 0x287   :  { %500 = vperm.xlu1 %1814, %v470_v39   ;;  %v478_v50 = vmul.f32 %v470_v39, %v2015_v13 }
 0x288   :  { %v477_v47 = vmul.f32 %v469_v46, %v425_v6 }
 0x289   :  { %v482_v54 = vsub.f32 %v474_v51, %v478_v50 }
 0x28a   :  { %v481_v49 = vsub.f32 %v473_v48, %v477_v47 }
 0x28b   :  { %509 = vperm.xlu1 %1814, %v479_v45  }
 0x28f   :  { %495 = vperm.xlu1 %1814, %v469_v46  }
 0x293   :  { %519 = vperm.xlu1 %1814, %v481_v49  }
 0x297   :  { %524 = vperm.xlu1 %1814, %v482_v54  }
 0x2fa   :  { %v491_v3 = vpop.permute.xlu1 %490 }
 0x2fb   :  { %v504_v57 = vmul.f32 %v1987_v35, %v491_v3 }
 0x2fe   :  { %v515_v4 = vpop.permute.xlu1 %514  ;;  %v486_v5 = vpop.permute.xlu0 %485 }
 0x2ff   :  { %v528_v58 = vadd.f32 %v515_v4, %v504_v57  ;;  %v503_v7 = vmul.f32 %v486_v5, %v1989_v36 }
 0x301   :  { %v532_v60 = vmax.f32 %v528_v58, 0.0 }
 0x306   :  { %v501_v56 = vpop.permute.xlu1 %500 }
 0x307   :  { %v506_v1 = vmul.f32 %v1998_v41, %v501_v56  ;;  %v717_v41 = vld [vmem:[%s2296_s4] sm:$0xff] }
 0x30a   :  { %v510_v9 = vpop.permute.xlu1 %509 }
 0x30b   :  { %v527_v59 = vadd.f32 %v510_v9, %v503_v7 }
 0x30d   :  { %v531_v61 = vmax.f32 %v527_v59, 0.0 }
 0x30e   :  { %v496_v62 = vpop.permute.xlu1 %495 }
 0x30f   :  { %1583 = vmatprep.mubr.msk.f32.mxu1 %vm126_vm0, %v531_v61  ;;  %v1755_v63 = vpack.c.bf16 %v532_v60, %v531_v61  ;;  %v505_v0 = vmul.f32 %v496_v62, %v2002_v43 }
 0x310   :  { %1584 = vmatmul.mubr.msk.f32.vlgmr.msra.gmra.mrb[8].mxu1 %vm126_vm0, %v532_v60 }
 0x311   :  { %1742 = vmatpush3.bf16.msk.msra.mxu1 %vm2066_vm11, %v1843_v12 }
 0x312   :  { %v520_v35 = vpop.permute.xlu1 %519  ;;  %1744 = vmatprep.subr.msk.bf16.mxu1 %vm2078_vm1, %v1843_v12 }
 0x313   :  { %v529_v36 = vadd.f32 %v520_v35, %v505_v0 }
 0x315   :  { %v533_v6 = vmax.f32 %v529_v36, 0.0  ;;  %1746 = vmatpush3.bf16.msk.msra.mxu1 %vm2078_vm1, %v1843_v12 }
 0x316   :  { %v525_v8 = vpop.permute.xlu1 %524 }
 0x317   :  { %v530_v10 = vadd.f32 %v525_v8, %v506_v1  ;;  %1586 = vmatprep.mubr.msk.f32.mxu1 %vm126_vm0, %v533_v6 }
 0x319   :  { %v534_v43 = vmax.f32 %v530_v10, 0.0 }
 0x31b   :  { %1587 = vmatmul.mubr.msk.f32.gmra.mrb[10].mxu1 %vm126_vm0, %v534_v43  ;;  %v1759_v11 = vpack.c.bf16 %v534_v43, %v533_v6 }
 0x31c   :  { %1597 = vmatprep.mubr.msk.f32.mxu1 %vm126_vm0, %v531_v61 }
 0x31f   :  { %1598 = vmatmul.mubr.msk.f32.vlgmr.msra.gmra.mrb[12].mxu1 %vm126_vm0, %v532_v60 }
 0x320   :  { %1600 = vmatprep.mubr.msk.f32.mxu1 %vm126_vm0, %v533_v6 }
 0x323   :  { %1601 = vmatmul.mubr.msk.f32.gmra.mrb[14].mxu1 %vm126_vm0, %v534_v43 }
 0x324   :  { %1627 = vmatprep.mubr.msk.f32.mxu1 %vm313_vm8, %v717_v41  ;;  %v863_v41 = vld [vmem:[%s2297_s5 + $0x8] sm:$0xff] }
 0x3e3   :  { %v1585_v13 = vpop.f32.mrb[8].mxu1 }
 0x3e4   :  { %v613_v14 = vpop.f32.mrb[9].mxu1 }
 0x3e5   :  { %v1747_v15 = vpack.c.bf16 %v1585_v13, %v613_v14 }
 0x3e7   :  { %1748 = vmatprep.subr.bf16.mxu1 %v1747_v15 }
 0x3e8   :  { %1750 = vmatpush3.bf16.msra.mxu1 %v1747_v15 }
 0x3ee   :  { %v1588_v16 = vpop.f32.mrb[10].mxu1 }
 0x3ef   :  { %v623_v17 = vpop.f32.mrb[11].mxu1 }
 0x3f0   :  { %v1751_v18 = vpack.c.bf16 %v1588_v16, %v623_v17  ;;  %v878_v17 = vld [vmem:[%s2298_s6] sm:$0xff] }
 0x3f2   :  { %v1599_v19 = vpop.f32.mrb[12].mxu1  ;;  %1752 = vmatprep.subr.bf16.mxu1 %v1751_v18 }
 0x3f3   :  { %v698_v20 = vpop.f32.mrb[13].mxu1  ;;  %1754 = vmatpush3.bf16.msra.mxu1 %v1751_v18 }
 0x3f4   :  { %v1763_v21 = vpack.c.bf16 %v1599_v19, %v698_v20  ;;  %1756 = vmatprep.subr.bf16.mxu1 %v1755_v63  ;;  %v879_v19 = vld [vmem:[%s2298_s6 + $0x8] sm:$0xff] }
 0x3f6   :  { %v1602_v22 = vpop.f32.mrb[14].mxu1 }
 0x3f7   :  { %v708_v23 = vpop.f32.mrb[15].mxu1  ;;  %1758 = vmatpush3.bf16.msra.mxu1 %v1755_v63 }
 0x3f8   :  { %v1767_v24 = vpack.c.bf16 %v1602_v22, %v708_v23  ;;  %1760 = vmatprep.subr.bf16.mxu1 %v1759_v11  ;;  %v864_v23 = vld [vmem:[%s2297_s5 + $0x10] sm:$0xff] }
 0x3fb   :  { %1762 = vmatpush3.bf16.msra.mxu1 %v1759_v11  ;;  %v862_v11 = vld [vmem:[%s2297_s5] sm:$0xff] }
 0x3fc   :  { %1764 = vmatprep.subr.bf16.mxu1 %v1763_v21 }
 0x3ff   :  { %1766 = vmatpush3.bf16.msra.mxu1 %v1763_v21 }
 0x400   :  { %1768 = vmatprep.subr.bf16.mxu1 %v1767_v24 }
 0x403   :  { %1770 = vmatpush3.bf16.msra.mxu1 %v1767_v24  ;;  %v865_v24 = vld [vmem:[%s2297_s5 + $0x18] sm:$0xff] }
 0x406   :  { %1628 = vmatmul.mubr.msk.f32.vlgmr.msra.gmra.mrb[16].mxu1 %vm313_vm8, %v718_v25 }
 0x407   :  { %1630 = vmatprep.mubr.msk.f32.mxu1 %vm313_vm8, %v719_v26 }
 0x40a   :  { %1631 = vmatmul.mubr.msk.f32.gmra.mrb[18].mxu1 %vm313_vm8, %v720_v27 }
 0x4d9   :  { %v2119_v28 = vpop.f32.mrb[16].mxu1 }
 0x4da   :  { %v2121_v29 = vpop.f32.mrb[17].mxu1  ;;  %v821_v30 = vsel %vm126_vm0, %v2119_v28, 0.0  ;;  %v835_v33 = vmul.f32 %v2119_v28, %v2119_v28 }
 0x4db   :  { %822 = vadd.xlane.f32.xlu0 %v821_v30  ;;  %v818_v31 = vsel %vm126_vm0, %v2121_v29, 0.0  ;;  %v834_v32 = vmul.f32 %v2121_v29, %v2121_v29 }
 0x4dc   :  { %819 = vadd.xlane.f32.xlu1 %v818_v31  ;;  %v841_v39 = vsel %vm126_vm0, %v835_v33, 0.0  ;;  %v880_v31 = vld [vmem:[%s2298_s6 + $0x10] sm:$0xff] }
 0x4dd   :  { %v838_v34 = vsel %vm126_vm0, %v834_v32, 0.0  ;;  %v2132_v37 = vpop.f32.mrb[18].mxu1  ;;  %v881_v32 = vld [vmem:[%s2298_s6 + $0x18] sm:$0xff] }
 0x4de   :  { %v2134_v38 = vpop.f32.mrb[19].mxu1  ;;  %v827_v42 = vsel %vm126_vm0, %v2132_v37, 0.0  ;;  %v837_v45 = vmul.f32 %v2132_v37, %v2132_v37 }
 0x4df   :  { %839 = vadd.xlane.f32.xlu0 %v838_v34  ;;  %v824_v40 = vsel %vm126_vm0, %v2134_v38, 0.0  ;;  %v836_v44 = vmul.f32 %v2134_v38, %v2134_v38 }
 0x4e0   :  { %842 = vadd.xlane.f32.xlu1 %v841_v39  ;;  %v847_v47 = vsel %vm126_vm0, %v837_v45, 0.0 }
 0x4e1   :  { %v844_v46 = vsel %vm126_vm0, %v836_v44, 0.0 }
 0x4e3   :  { %825 = vadd.xlane.f32.xlu0 %v824_v40 }
 0x4e4   :  { %828 = vadd.xlane.f32.xlu1 %v827_v42 }
 0x4e7   :  { %845 = vadd.xlane.f32.xlu0 %v844_v46 }
 0x4e8   :  { %848 = vadd.xlane.f32.xlu1 %v847_v47 }
 0x568   :  { %v823_v48 = vpop.xlane.xlu0 %822 }
 0x569   :  { %v820_v49 = vpop.xlane.xlu1 %819  ;;  %v831_v50 = vmul.f32 0.03125, %v823_v48 }
 0x56a   :  { %v830_v51 = vmul.f32 0.03125, %v820_v49 }
 0x56b   :  { %v855_v4 = vmul.f32 %v831_v50, %v831_v50 }
 0x56c   :  { %v854_v52 = vmul.f32 %v830_v51, %v830_v51  ;;  %v840_v53 = vpop.xlane.xlu0 %839 }
 0x56d   :  { %v850_v54 = vmul.f32 0.03125, %v840_v53  ;;  %v843_v3 = vpop.xlane.xlu1 %842 }
 0x56e   :  { %v851_v5 = vmul.f32 0.03125, %v843_v3 }
 0x56f   :  { %v858_v56 = vsub.f32 %v850_v54, %v854_v52 }
 0x570   :  { %v859_v57 = vsub.f32 %v851_v5, %v855_v4  ;;  %v826_v58 = vpop.xlane.xlu0 %825 }
 0x571   :  { %v866_v7 = vadd.f32 1e-05, %v858_v56  ;;  %v832_v9 = vmul.f32 0.03125, %v826_v58  ;;  %v829_v59 = vpop.xlane.xlu1 %828 }
 0x572   :  { %v867_v60 = vadd.f32 1e-05, %v859_v57  ;;  %v833_v61 = vmul.f32 0.03125, %v829_v59 }
 0x573   :  { %1823 = vrsqrt.f32 %v866_v7  ;;  %v856_v63 = vmul.f32 %v832_v9, %v832_v9 }
 0x574   :  { %1825 = vrsqrt.f32 %v867_v60  ;;  %v846_v62 = vpop.xlane.xlu0 %845  ;;  %v857_v36 = vmul.f32 %v833_v61, %v833_v61 }
 0x575   :  { %v852_v0 = vmul.f32 0.03125, %v846_v62  ;;  %v849_v35 = vpop.xlane.xlu1 %848 }
 0x576   :  { %v853_v1 = vmul.f32 0.03125, %v849_v35 }
 0x577   :  { %v860_v6 = vsub.f32 %v852_v0, %v856_v63 }
 0x578   :  { %v861_v8 = vsub.f32 %v853_v1, %v857_v36  ;;  %v1125_v1 = vld [vmem:[%s2299_s7 + $0x8] sm:$0xff] }
 0x579   :  { %v868_v10 = vadd.f32 1e-05, %v860_v6  ;;  %v1126_v6 = vld [vmem:[%s2299_s7 + $0x10] sm:$0xff] }
 0x57a   :  { %v869_v43 = vadd.f32 1e-05, %v861_v8  ;;  %v1127_v8 = vld [vmem:[%s2299_s7 + $0x18] sm:$0xff] }
 0x57b   :  { %1827 = vrsqrt.f32 %v868_v10 }
 0x57c   :  { %1829 = vrsqrt.f32 %v869_v43 }
 0x57d   :  { %v1824_v13 = vpop.eup %1823 }
 0x57e   :  { %v1826_v14 = vpop.eup %1825  ;;  %v874_v15 = vmul.f32 %v1824_v13, %v862_v11 }
 0x57f   :  { %v875_v16 = vmul.f32 %v1826_v14, %v863_v41 }
 0x580   :  { %892 = vperm.xlu0 %1813, %v874_v15   ;;  %v882_v18 = vmul.f32 %v874_v15, %v830_v51 }
 0x581   :  { %897 = vperm.xlu1 %1814, %v875_v16   ;;  %v883_v20 = vmul.f32 %v875_v16, %v831_v50 }
 0x582   :  { %v886_v21 = vsub.f32 %v878_v17, %v882_v18 }
 0x583   :  { %v887_v22 = vsub.f32 %v879_v19, %v883_v20 }
 0x585   :  { %v1828_v25 = vpop.eup %1827  ;;  %916 = vperm.xlu1 %1814, %v886_v21   ;;  %921 = vperm.xlu0 %1813, %v887_v22  }
 0x586   :  { %v1830_v26 = vpop.eup %1829  ;;  %v876_v27 = vmul.f32 %v1828_v25, %v864_v23 }
 0x587   :  { %v877_v30 = vmul.f32 %v1830_v26, %v865_v24 }
 0x588   :  { %v884_v33 = vmul.f32 %v876_v27, %v832_v9 }
 0x589   :  { %907 = vperm.xlu0 %1813, %v877_v30   ;;  %902 = vperm.xlu1 %1814, %v876_v27   ;;  %v885_v34 = vmul.f32 %v877_v30, %v833_v61 }
 0x58a   :  { %v888_v39 = vsub.f32 %v880_v31, %v884_v33 }
 0x58b   :  { %v889_v40 = vsub.f32 %v881_v32, %v885_v34 }
 0x58d   :  { %931 = vperm.xlu0 %1813, %v889_v40   ;;  %926 = vperm.xlu1 %1814, %v888_v39  }
 0x5ff   :  { %v893_v42 = vpop.permute.xlu0 %892 }
 0x600   :  { %v898_v44 = vpop.permute.xlu1 %897  ;;  %v910_v45 = vmul.f32 %v893_v42, %v2121_v29 }
 0x601   :  { %v911_v46 = vmul.f32 %v2119_v28, %v898_v44 }
 0x604   :  { %v917_v47 = vpop.permute.xlu1 %916  ;;  %v922_v48 = vpop.permute.xlu0 %921 }
 0x605   :  { %v934_v49 = vadd.f32 %v917_v47, %v910_v45  ;;  %v935_v50 = vadd.f32 %v922_v48, %v911_v46 }
 0x607   :  { %v938_v51 = vmax.f32 %v934_v49, 0.0  ;;  %v939_v52 = vmax.f32 %v935_v50, 0.0 }
 0x608   :  { %v903_v53 = vpop.permute.xlu1 %902  ;;  %v908_v54 = vpop.permute.xlu0 %907 }
 0x609   :  { %1641 = vmatprep.mubr.msk.f32.mxu0 %vm126_vm0, %v938_v51  ;;  %v1795_v3 = vpack.c.bf16 %v939_v52, %v938_v51  ;;  %v912_v4 = vmul.f32 %v903_v53, %v2134_v38  ;;  %v913_v5 = vmul.f32 %v2132_v37, %v908_v54 }
 0x60a   :  { %1642 = vmatmul.mubr.msk.f32.vlgmr.msra.gmra.mrb[4].mxu0 %vm126_vm0, %v939_v52 }
 0x60b   :  { %1782 = vmatpush3.bf16.msk.msra.mxu0 %vm2066_vm11, %v1843_v12 }
 0x60c   :  { %v927_v28 = vpop.permute.xlu1 %926  ;;  %v932_v29 = vpop.permute.xlu0 %931  ;;  %1784 = vmatprep.subr.msk.bf16.mxu0 %vm2078_vm1, %v1843_v12 }
 0x60d   :  { %v936_v56 = vadd.f32 %v927_v28, %v912_v4  ;;  %v937_v57 = vadd.f32 %v932_v29, %v913_v5 }
 0x60f   :  { %v940_v58 = vmax.f32 %v936_v56, 0.0  ;;  %v941_v7 = vmax.f32 %v937_v57, 0.0  ;;  %1786 = vmatpush3.bf16.msk.msra.mxu0 %vm2078_vm1, %v1843_v12  ;;  %v1269_v57 = vld [vmem:[%s2300_s8] sm:$0xff] }
 0x611   :  { %1644 = vmatprep.mubr.msk.f32.mxu0 %vm126_vm0, %v940_v58  ;;  %v1799_v37 = vpack.c.bf16 %v941_v7, %v940_v58 }
 0x612   :  { %1645 = vmatmul.mubr.msk.f32.gmra.mrb[6].mxu0 %vm126_vm0, %v941_v7 }
 0x613   :  { %1655 = vmatprep.mubr.msk.f32.mxu0 %vm126_vm0, %v938_v51 }
 0x616   :  { %1656 = vmatmul.mubr.msk.f32.vlgmr.msra.gmra.mrb[8].mxu0 %vm126_vm0, %v939_v52 }
 0x617   :  { %1658 = vmatprep.mubr.msk.f32.mxu0 %vm126_vm0, %v940_v58  ;;  %v1270_v58 = vld [vmem:[%s2300_s8 + $0x8] sm:$0xff] }
 0x61a   :  { %1659 = vmatmul.mubr.msk.f32.gmra.mrb[10].mxu0 %vm126_vm0, %v941_v7 }
 0x61b   :  { %1685 = vmatprep.mubr.msk.f32.mxu0 %vm313_vm8, %v1124_v55 }
 0x6dd   :  { %v1643_v12 = vpop.f32.mrb[4].mxu0 }
 0x6de   :  { %v1020_v2 = vpop.f32.mrb[5].mxu0 }
 0x6df   :  { %v1787_v38 = vpack.c.bf16 %v1643_v12, %v1020_v2  ;;  %v1271_v2 = vld [vmem:[%s2300_s8 + $0x10] sm:$0xff] }
 0x6e1   :  { %1788 = vmatprep.subr.bf16.mxu0 %v1787_v38 }
 0x6e2   :  { %1790 = vmatpush3.bf16.msra.mxu0 %v1787_v38  ;;  %v1272_v38 = vld [vmem:[%s2300_s8 + $0x18] sm:$0xff] }
 0x6e5   :  { %v1646_v9 = vpop.f32.mrb[6].mxu0 }
 0x6e6   :  { %v1030_v59 = vpop.f32.mrb[7].mxu0 }
 0x6e7   :  { %v1791_v60 = vpack.c.bf16 %v1646_v9, %v1030_v59 }
 0x6e9   :  { %v1657_v61 = vpop.f32.mrb[8].mxu0  ;;  %1792 = vmatprep.subr.bf16.mxu0 %v1791_v60 }
 0x6ea   :  { %v1105_v62 = vpop.f32.mrb[9].mxu0  ;;  %1794 = vmatpush3.bf16.msra.mxu0 %v1791_v60 }
 0x6eb   :  { %v1803_v63 = vpack.c.bf16 %v1657_v61, %v1105_v62  ;;  %1796 = vmatprep.subr.bf16.mxu0 %v1795_v3 }
 0x6ed   :  { %v1660_v0 = vpop.f32.mrb[10].mxu0 }
 0x6ee   :  { %v1115_v35 = vpop.f32.mrb[11].mxu0  ;;  %1798 = vmatpush3.bf16.msra.mxu0 %v1795_v3 }
 0x6ef   :  { %v1807_v36 = vpack.c.bf16 %v1660_v0, %v1115_v35  ;;  %1800 = vmatprep.subr.bf16.mxu0 %v1799_v37  ;;  %v1286_v35 = vld [vmem:[%s2301_s9 + $0x8] sm:$0xff] }
 0x6f2   :  { %1802 = vmatpush3.bf16.msra.mxu0 %v1799_v37 }
 0x6f3   :  { %1804 = vmatprep.subr.bf16.mxu0 %v1803_v63 }
 0x6f6   :  { %1806 = vmatpush3.bf16.msra.mxu0 %v1803_v63  ;;  %v1285_v63 = vld [vmem:[%s2301_s9] sm:$0xff] }
 0x6f7   :  { %1808 = vmatprep.subr.bf16.mxu0 %v1807_v36 }
 0x6fa   :  { %1810 = vmatpush3.bf16.msra.mxu0 %v1807_v36 }
 0x6fd   :  { %1686 = vmatmul.mubr.msk.f32.vlgmr.msra.gmra.mrb[12].mxu0 %vm313_vm8, %v1125_v1 }
 0x6fe   :  { %1688 = vmatprep.mubr.msk.f32.mxu0 %vm313_vm8, %v1126_v6 }
 0x701   :  { %1689 = vmatmul.mubr.msk.f32.gmra.mrb[14].mxu0 %vm313_vm8, %v1127_v8  ;;  %v1287_v8 = vld [vmem:[%s2301_s9 + $0x10] sm:$0xff] }
 0x7d0   :  { %v2208_v10 = vpop.f32.mrb[12].mxu0 }
 0x7d1   :  { %v2210_v43 = vpop.f32.mrb[13].mxu0  ;;  %v1228_v11 = vsel %vm126_vm0, %v2208_v10, 0.0  ;;  %v1242_v14 = vmul.f32 %v2208_v10, %v2208_v10 }
 0x7d2   :  { %1229 = vadd.xlane.f32.xlu0 %v1228_v11  ;;  %v1225_v41 = vsel %vm126_vm0, %v2210_v43, 0.0  ;;  %v1241_v13 = vmul.f32 %v2210_v43, %v2210_v43 }
 0x7d3   :  { %1226 = vadd.xlane.f32.xlu1 %v1225_v41  ;;  %v1248_v18 = vsel %vm126_vm0, %v1242_v14, 0.0  ;;  %v1288_v41 = vld [vmem:[%s2301_s9 + $0x18] sm:$0xff] }
 0x7d4   :  { %v1245_v15 = vsel %vm126_vm0, %v1241_v13, 0.0  ;;  %v2221_v16 = vpop.f32.mrb[14].mxu0 }
 0x7d5   :  { %v2223_v17 = vpop.f32.mrb[15].mxu0  ;;  %v1234_v20 = vsel %vm126_vm0, %v2221_v16, 0.0  ;;  %v1244_v22 = vmul.f32 %v2221_v16, %v2221_v16 }
 0x7d6   :  { %1246 = vadd.xlane.f32.xlu0 %v1245_v15  ;;  %v1231_v19 = vsel %vm126_vm0, %v2223_v17, 0.0  ;;  %v1243_v21 = vmul.f32 %v2223_v17, %v2223_v17 }
 0x7d7   :  { %1249 = vadd.xlane.f32.xlu1 %v1248_v18  ;;  %v1254_v24 = vsel %vm126_vm0, %v1244_v22, 0.0 }
 0x7d8   :  { %v1251_v23 = vsel %vm126_vm0, %v1243_v21, 0.0 }
 0x7da   :  { %1232 = vadd.xlane.f32.xlu0 %v1231_v19 }
 0x7db   :  { %1235 = vadd.xlane.f32.xlu1 %v1234_v20 }
 0x7de   :  { %1252 = vadd.xlane.f32.xlu0 %v1251_v23 }
 0x7df   :  { %1255 = vadd.xlane.f32.xlu1 %v1254_v24 }
 0x85f   :  { %v1230_v25 = vpop.xlane.xlu0 %1229 }
 0x860   :  { %v1227_v26 = vpop.xlane.xlu1 %1226  ;;  %v1238_v27 = vmul.f32 0.03125, %v1230_v25 }
 0x861   :  { %v1237_v30 = vmul.f32 0.03125, %v1227_v26 }
 0x862   :  { %v1262_v39 = vmul.f32 %v1238_v27, %v1238_v27 }
 0x863   :  { %v1261_v31 = vmul.f32 %v1237_v30, %v1237_v30  ;;  %v1247_v32 = vpop.xlane.xlu0 %1246 }
 0x864   :  { %v1257_v33 = vmul.f32 0.03125, %v1247_v32  ;;  %v1250_v34 = vpop.xlane.xlu1 %1249 }
 0x865   :  { %v1258_v40 = vmul.f32 0.03125, %v1250_v34  ;;  %v1839_v34 = vld [vmem:[%s2292_s0] sm:$0xff] }
 0x866   :  { %v1265_v42 = vsub.f32 %v1257_v33, %v1261_v31 }
 0x867   :  { %v1266_v44 = vsub.f32 %v1258_v40, %v1262_v39  ;;  %v1233_v45 = vpop.xlane.xlu0 %1232 }
 0x868   :  { %v1273_v46 = vadd.f32 1e-05, %v1265_v42  ;;  %v1239_v47 = vmul.f32 0.03125, %v1233_v45  ;;  %v1236_v48 = vpop.xlane.xlu1 %1235  ;;  %v1841_v45 = vld [vmem:[%s2292_s0 + $0x10] sm:$0xff] }
 0x869   :  { %v1274_v49 = vadd.f32 1e-05, %v1266_v44  ;;  %v1240_v50 = vmul.f32 0.03125, %v1236_v48 }
 0x86a   :  { %1831 = vrsqrt.f32 %v1273_v46  ;;  %v1263_v52 = vmul.f32 %v1239_v47, %v1239_v47 }
 0x86b   :  { %1833 = vrsqrt.f32 %v1274_v49  ;;  %v1253_v51 = vpop.xlane.xlu0 %1252  ;;  %v1264_v3 = vmul.f32 %v1240_v50, %v1240_v50 }
 0x86c   :  { %v1259_v53 = vmul.f32 0.03125, %v1253_v51  ;;  %v1256_v54 = vpop.xlane.xlu1 %1255 }
 0x86d   :  { %v1260_v4 = vmul.f32 0.03125, %v1256_v54 }
 0x86e   :  { %v1267_v5 = vsub.f32 %v1259_v53, %v1263_v52 }
 0x86f   :  { %v1268_v28 = vsub.f32 %v1260_v4, %v1264_v3 }
 0x870   :  { %v1275_v29 = vadd.f32 1e-05, %v1267_v5 }
 0x871   :  { %v1276_v56 = vadd.f32 1e-05, %v1268_v28 }
 0x872   :  { %1835 = vrsqrt.f32 %v1275_v29 }
 0x873   :  { %1837 = vrsqrt.f32 %v1276_v56 }
 0x874   :  { %v1832_v7 = vpop.eup %1831 }
 0x875   :  { %v1834_v37 = vpop.eup %1833  ;;  %v1281_v55 = vmul.f32 %v1832_v7, %v1269_v57 }
 0x876   :  { %v1282_v12 = vmul.f32 %v1834_v37, %v1270_v58 }
 0x877   :  { %1299 = vperm.xlu0 %1813, %v1281_v55   ;;  %v1289_v61 = vmul.f32 %v1281_v55, %v1237_v30 }
 0x878   :  { %1304 = vperm.xlu1 %1814, %v1282_v12   ;;  %v1290_v0 = vmul.f32 %v1282_v12, %v1238_v27 }
 0x879   :  { %v1293_v36 = vsub.f32 %v1285_v63, %v1289_v61 }
 0x87a   :  { %v1294_v6 = vsub.f32 %v1286_v35, %v1290_v0 }
 0x87c   :  { %v1836_v9 = vpop.eup %1835 }
 0x87d   :  { %v1838_v59 = vpop.eup %1837  ;;  %v1283_v60 = vmul.f32 %v1836_v9, %v1271_v2 }
 0x87e   :  { %v1284_v62 = vmul.f32 %v1838_v59, %v1272_v38 }
 0x87f   :  { %1309 = vperm.xlu1 %1814, %v1283_v60   ;;  %v1291_v1 = vmul.f32 %v1283_v60, %v1239_v47  ;;  %v1842_v47 = vld [vmem:[%s2292_s0 + $0x18] sm:$0xff] }
 0x880   :  { %1314 = vperm.xlu0 %1813, %v1284_v62   ;;  %v1292_v11 = vmul.f32 %v1284_v62, %v1240_v50 }
 0x881   :  { %v1295_v13 = vsub.f32 %v1287_v8, %v1291_v1 }
 0x882   :  { %v1296_v14 = vsub.f32 %v1288_v41, %v1292_v11 }
 0x883   :  { %1323 = vperm.xlu1 %1814, %v1293_v36  }
 0x884   :  { %1328 = vperm.xlu0 %1813, %v1294_v6  }
 0x887   :  { %1333 = vperm.xlu1 %1814, %v1295_v13  }
 0x888   :  { %1338 = vperm.xlu0 %1813, %v1296_v14  }
 0x8f6   :  { %v1300_v18 = vpop.permute.xlu0 %1299 }
 0x8f7   :  { %v1305_v15 = vpop.permute.xlu1 %1304  ;;  %v1317_v21 = vmul.f32 %v1300_v18, %v2210_v43 }
 0x8f8   :  { %v1318_v22 = vmul.f32 %v2208_v10, %v1305_v15  ;;  %v1840_v10 = vld [vmem:[%s2292_s0 + $0x8] sm:$0xff] }
 0x8fe   :  { %v1310_v19 = vpop.permute.xlu1 %1309 }
 0x8ff   :  { %v1315_v20 = vpop.permute.xlu0 %1314  ;;  %v1319_v27 = vmul.f32 %v1310_v19, %v2223_v17 }
 0x900   :  { %v1320_v31 = vmul.f32 %v2221_v16, %v1315_v20 }
 0x902   :  { %v1324_v23 = vpop.permute.xlu1 %1323 }
 0x903   :  { %v1341_v24 = vadd.f32 %v1324_v23, %v1317_v21  ;;  %v1329_v25 = vpop.permute.xlu0 %1328 }
 0x904   :  { %v1342_v26 = vadd.f32 %v1329_v25, %v1318_v22 }
 0x905   :  { %v1345_v30 = vmax.f32 %v1341_v24, 0.0 }
 0x906   :  { %v1346_v32 = vmax.f32 %v1342_v26, 0.0  ;;  %v1334_v33 = vpop.permute.xlu1 %1333 }
 0x907   :  { %v1349_v39 = vadd.f32 %v1839_v34, %v1345_v30  ;;  %v1343_v40 = vadd.f32 %v1334_v33, %v1319_v27  ;;  %v1339_v43 = vpop.permute.xlu0 %1338 }
 0x908   :  { %v1350_v42 = vadd.f32 %v1840_v10, %v1346_v32  ;;  %v1344_v44 = vadd.f32 %v1339_v43, %v1320_v31 }
 0x909   :  { %1353 = vst.msk [vmem:[%s2302_s10] sm:$0xff] %vm126_vm0, %v1349_v39  ;;  %v1347_v16 = vmax.f32 %v1343_v40, 0.0 }
 0x90a   :  { %1354 = vst.msk [vmem:[%s2302_s10 + $0x8] sm:$0xff] %vm126_vm0, %v1350_v42  ;;  %v1348_v17 = vmax.f32 %v1344_v44, 0.0 }
 0x90b   :  { %v1351_v46 = vadd.f32 %v1841_v45, %v1347_v16 }
 0x90c   :  { %v1352_v48 = vadd.f32 %v1842_v47, %v1348_v17 }
 0x90d   :  { %1355 = vst.msk [vmem:[%s2302_s10 + $0x10] sm:$0xff] %vm126_vm0, %v1351_v46 }
 0x90e   :  { %1356 = vst.msk [vmem:[%s2302_s10 + $0x18] sm:$0xff] %vm126_vm0, %v1352_v48 }

</bundles_post_ra>
